<compile_context>
chip_gen: v7x
topology: tpu7x:2x2x1
jax: 0.10.0
libtpu: 0.0.40
codegen_flags: <defaults>
</compile_context>

<pallas_src>
import jax
import jax.numpy as jnp
from jax.experimental import pallas as pl
from jax.experimental.pallas import tpu as pltpu

LANE = 128  # TPU lane width; all feature dims are zero-padded to this.


def _round_up(n, m):
    return ((n + m - 1) // m) * m


def _pad2d(a, rows, cols):
    a = a.astype(jnp.float32)
    return jnp.pad(a, ((0, rows - a.shape[0]), (0, cols - a.shape[1])))


# ---------------------------------------------------------------------------
# Kernel: whole forward for one batch tile.  Params stay VMEM-resident.
# ---------------------------------------------------------------------------
def _inner_vae_kernel(x_ref, eps_ref, w_ref, b_ref, out_ref):
    # w_ref: [7, 128, 128]  (ew1, ew2, ew_mu, ew_logvar, dw1, dw2, dw3), zero-padded
    # b_ref: [7, 1, 128]    matching biases, zero-padded
    def dense(v, i):
        return jnp.dot(v, w_ref[i], preferred_element_type=jnp.float32) + b_ref[i]

    x = x_ref[...]                       # [tb, 128]

    # ----- encoder MLP -----
    h = jnp.maximum(dense(x, 0), 0.0)
    h = jnp.maximum(dense(h, 1), 0.0)
    mu = dense(h, 2)                     # mu head   (lane offset 0, no chunk slice)
    logvar = dense(h, 3)                 # logvar head

    # ----- reparameterization: z = mu + eps * exp(0.5*logvar) -----
    # padded lanes: logvar=0 -> std=1, eps=0 -> z=0, so padding stays exact.
    z = mu + eps_ref[...] * jnp.exp(0.5 * logvar)

    # ----- decoder MLP -----
    d = jnp.maximum(dense(z, 4), 0.0)
    d = jnp.maximum(dense(d, 5), 0.0)
    x_rec = dense(d, 6)

    # One lane-dense output slab: [x_rec | mu | logvar], 128-aligned offsets.
    out_ref[:, 0 * LANE:1 * LANE] = x_rec
    out_ref[:, 1 * LANE:2 * LANE] = mu
    out_ref[:, 2 * LANE:3 * LANE] = logvar


# ---------------------------------------------------------------------------
# Host-side parameter packing (done once, outside the hot path).
# ---------------------------------------------------------------------------
def pack_params(params):
    """Splits the encoder head into mu/logvar heads, zero-pads every layer to
    [128,128] / [1,128] and stacks into two slabs (2 DMAs instead of 12)."""
    latent_dim = params["ew3"].shape[1] // 2
    ew_mu, ew_logvar = params["ew3"][:, :latent_dim], params["ew3"][:, latent_dim:]
    eb_mu, eb_logvar = params["eb3"][:, :latent_dim], params["eb3"][:, latent_dim:]

    ws = [params["ew1"], params["ew2"], ew_mu, ew_logvar,
          params["dw1"], params["dw2"], params["dw3"]]
    bs = [params["eb1"], params["eb2"], eb_mu, eb_logvar,
          params["db1"], params["db2"], params["db3"]]

    for w in ws:
        # TODO(synk): feature dims > 128 would need per-layer padded widths + K tiling.
        assert w.shape[0] <= LANE and w.shape[1] <= LANE

    w_slab = jnp.stack([_pad2d(w, LANE, LANE) for w in ws])   # [7, 128, 128]
    b_slab = jnp.stack([_pad2d(b, 1, LANE) for b in bs])      # [7, 1, 128]
    return w_slab, b_slab


# ---------------------------------------------------------------------------
# Wrapper
# ---------------------------------------------------------------------------
def inner_vae_forward(x, eps, w_slab, b_slab, *, input_dim, latent_dim,
                      batch_tile=256):
    """InnerVae forward: returns (x_rec, mu, logvar).

    x:   [batch, input_dim] float32
    eps: [batch, latent_dim] float32 standard-normal noise (torch.randn_like)
    w_slab, b_slab: from pack_params()
    """
    batch = x.shape[0]

    # Batch tile: multiple of 8 sublanes; pad batch up to a multiple of it.
    tb = min(batch_tile, _round_up(batch, 8))
    b_pad = _round_up(batch, tb)

    x_p = jnp.pad(x.astype(jnp.float32),
                  ((0, b_pad - batch), (0, LANE - input_dim)))
    eps_p = jnp.pad(eps.astype(jnp.float32),
                    ((0, b_pad - batch), (0, LANE - latent_dim)))

    out = pl.pallas_call(
        _inner_vae_kernel,
        out_shape=jax.ShapeDtypeStruct((b_pad, 3 * LANE), jnp.float32),
        grid=(b_pad // tb,),
        in_specs=[
            pl.BlockSpec((tb, LANE), lambda i: (i, 0)),            # x
            pl.BlockSpec((tb, LANE), lambda i: (i, 0)),            # eps
            pl.BlockSpec((7, LANE, LANE), lambda i: (0, 0, 0)),    # weights (resident)
            pl.BlockSpec((7, 1, LANE), lambda i: (0, 0, 0)),       # biases  (resident)
        ],
        out_specs=pl.BlockSpec((tb, 3 * LANE), lambda i: (i, 0)),
        compiler_params=pltpu.CompilerParams(
            dimension_semantics=("parallel",)),
    )(x_p, eps_p, w_slab, b_slab)

    x_rec = out[:batch, :input_dim]
    mu = out[:batch, LANE:LANE + latent_dim]
    logvar = out[:batch, 2 * LANE:2 * LANE + latent_dim]
    return x_rec, mu, logvar


# ---------------------------------------------------------------------------
# Parameter init (torch nn.Linear-like) and pure-JAX reference.
# ---------------------------------------------------------------------------
def init_params(key, input_dim, latent_dim):
    output_dim = latent_dim * 2
    enc_h1 = (input_dim + output_dim) // 2
    enc_h2 = (input_dim + 3 * output_dim) // 4
    dec_h1 = (input_dim + 3 * latent_dim) // 4
    dec_h2 = (input_dim + latent_dim) // 2

    layer_dims = {
        "e1": (input_dim, enc_h1),
        "e2": (enc_h1, enc_h2),
        "e3": (enc_h2, output_dim),
        "d1": (latent_dim, dec_h1),
        "d2": (dec_h1, dec_h2),
        "d3": (dec_h2, input_dim),
    }

    params = {}
    keys = jax.random.split(key, 2 * len(layer_dims))
    for i, (name, (fan_in, fan_out)) in enumerate(layer_dims.items()):
        bound = 1.0 / jnp.sqrt(jnp.float32(fan_in))
        w = jax.random.uniform(keys[2 * i], (fan_in, fan_out), jnp.float32,
                               minval=-bound, maxval=bound)
        b = jax.random.uniform(keys[2 * i + 1], (1, fan_out), jnp.float32,
                               minval=-bound, maxval=bound)
        prefix = "e" if name.startswith("e") else "d"
        idx = name[1]
        params[f"{prefix}w{idx}"] = w
        params[f"{prefix}b{idx}"] = b
    return params


def reference_forward(x, eps, params):
    h = jnp.maximum(x @ params["ew1"] + params["eb1"], 0.0)
    h = jnp.maximum(h @ params["ew2"] + params["eb2"], 0.0)
    enc_out = h @ params["ew3"] + params["eb3"]
    latent_dim = enc_out.shape[1] // 2
    mu, logvar = enc_out[:, :latent_dim], enc_out[:, latent_dim:]
    z = mu + eps * jnp.exp(0.5 * logvar)
    d = jnp.maximum(z @ params["dw1"] + params["db1"], 0.0)
    d = jnp.maximum(d @ params["dw2"] + params["db2"], 0.0)
    x_rec = d @ params["dw3"] + params["db3"]
    return x_rec, mu, logvar


if __name__ == "__main__":
    batch = 8
    input_dim = 32
    latent_dim = 8

    key = jax.random.PRNGKey(0)
    k_params, k_x, k_eps = jax.random.split(key, 3)

    params = init_params(k_params, input_dim, latent_dim)
    x = jax.random.normal(k_x, (batch, input_dim), jnp.float32)
    # torch.randn_like(std) -> host-generated standard-normal noise (deterministic)
    eps = jax.random.normal(k_eps, (batch, latent_dim), jnp.float32)

    w_slab, b_slab = pack_params(params)
    x_rec, mu, logvar = inner_vae_forward(
        x, eps, w_slab, b_slab, input_dim=input_dim, latent_dim=latent_dim)
    jax.block_until_ready((x_rec, mu, logvar))

    # correctness check against pure-JAX reference
    r_rec, r_mu, r_logvar = reference_forward(x, eps, params)
    assert jnp.allclose(x_rec, r_rec, atol=1e-5), "x_rec mismatch"
    assert jnp.allclose(mu, r_mu, atol=1e-5), "mu mismatch"
    assert jnp.allclose(logvar, r_logvar, atol=1e-5), "logvar mismatch"
    assert x_rec.shape == (batch, input_dim)
    assert mu.shape == (batch, latent_dim)
    assert logvar.shape == (batch, latent_dim)

    print("KERNEL_OK")
</pallas_src>

<mosaic_0001>
module attributes {stable_mosaic.version = 11 : i64} {
  func.func @_inner_vae_kernel(%arg0: i32, %arg1: memref<8x128xf32, #tpu.memory_space<vmem>>, %arg2: memref<8x128xf32, #tpu.memory_space<vmem>>, %arg3: memref<7x128x128xf32, #tpu.memory_space<vmem>>, %arg4: memref<7x1x128xf32, #tpu.memory_space<vmem>>, %arg5: memref<8x384xf32, #tpu.memory_space<vmem>>) attributes {dimension_semantics = [#tpu.dimension_semantics<parallel>], iteration_bounds = array<i64: 1>, scalar_prefetch = 0 : i64, scratch_operands = 0 : i64, tpu.core_type = #tpu.core_type<tc>, window_params = [{transform_indices = @transform_0, window_bounds = array<i64: 8, 128>}, {transform_indices = @transform_1, window_bounds = array<i64: 8, 128>}, {pipeline_mode = #tpu.pipeline_mode<synchronous>, transform_indices = @transform_2, window_bounds = array<i64: 7, 128, 128>}, {pipeline_mode = #tpu.pipeline_mode<synchronous>, transform_indices = @transform_3, window_bounds = array<i64: 7, 1, 128>}, {transform_indices = @transform_4, window_bounds = array<i64: 8, 384>}]} {
    %c0 = arith.constant 0 : index
    %c0_0 = arith.constant 0 : index
    %0 = vector.load %arg1[%c0, %c0_0] : memref<8x128xf32, #tpu.memory_space<vmem>>, vector<8x128xf32>
    %c0_1 = arith.constant 0 : index
    %c0_2 = arith.constant 0 : index
    %c0_3 = arith.constant 0 : index
    %1 = vector.load %arg3[%c0_1, %c0_2, %c0_3] : memref<7x128x128xf32, #tpu.memory_space<vmem>>, vector<1x128x128xf32>
    %2 = vector.shape_cast %1 : vector<1x128x128xf32> to vector<128x128xf32>
    %cst = arith.constant dense<0.000000e+00> : vector<8x128xf32>
    %3 = tpu.matmul %0, %2, %cst {dimension_numbers = #tpu.dot_dimension_numbers<[1], [0], [0], [1], [0, 0, 1, 1], [], []>} : vector<8x128xf32>, vector<128x128xf32>, vector<8x128xf32> -> vector<8x128xf32>
    %c0_4 = arith.constant 0 : index
    %c0_5 = arith.constant 0 : index
    %c0_6 = arith.constant 0 : index
    %4 = vector.load %arg4[%c0_4, %c0_5, %c0_6] : memref<7x1x128xf32, #tpu.memory_space<vmem>>, vector<1x1x128xf32>
    %5 = vector.shape_cast %4 : vector<1x1x128xf32> to vector<1x128xf32>
    %6 = vector.broadcast %5 : vector<1x128xf32> to vector<8x128xf32>
    %7 = arith.addf %3, %6 : vector<8x128xf32>
    %cst_7 = arith.constant 0.000000e+00 : f32
    %8 = vector.broadcast %cst_7 : f32 to vector<8x128xf32>
    %9 = arith.maximumf %7, %8 : vector<8x128xf32>
    %c1 = arith.constant 1 : index
    %c0_8 = arith.constant 0 : index
    %c0_9 = arith.constant 0 : index
    %10 = vector.load %arg3[%c1, %c0_8, %c0_9] : memref<7x128x128xf32, #tpu.memory_space<vmem>>, vector<1x128x128xf32>
    %11 = vector.shape_cast %10 : vector<1x128x128xf32> to vector<128x128xf32>
    %cst_10 = arith.constant dense<0.000000e+00> : vector<8x128xf32>
    %12 = tpu.matmul %9, %11, %cst_10 {dimension_numbers = #tpu.dot_dimension_numbers<[1], [0], [0], [1], [0, 0, 1, 1], [], []>} : vector<8x128xf32>, vector<128x128xf32>, vector<8x128xf32> -> vector<8x128xf32>
    %c1_11 = arith.constant 1 : index
    %c0_12 = arith.constant 0 : index
    %c0_13 = arith.constant 0 : index
    %13 = vector.load %arg4[%c1_11, %c0_12, %c0_13] : memref<7x1x128xf32, #tpu.memory_space<vmem>>, vector<1x1x128xf32>
    %14 = vector.shape_cast %13 : vector<1x1x128xf32> to vector<1x128xf32>
    %15 = vector.broadcast %14 : vector<1x128xf32> to vector<8x128xf32>
    %16 = arith.addf %12, %15 : vector<8x128xf32>
    %cst_14 = arith.constant 0.000000e+00 : f32
    %17 = vector.broadcast %cst_14 : f32 to vector<8x128xf32>
    %18 = arith.maximumf %16, %17 : vector<8x128xf32>
    %c2 = arith.constant 2 : index
    %c0_15 = arith.constant 0 : index
    %c0_16 = arith.constant 0 : index
    %19 = vector.load %arg3[%c2, %c0_15, %c0_16] : memref<7x128x128xf32, #tpu.memory_space<vmem>>, vector<1x128x128xf32>
    %20 = vector.shape_cast %19 : vector<1x128x128xf32> to vector<128x128xf32>
    %cst_17 = arith.constant dense<0.000000e+00> : vector<8x128xf32>
    %21 = tpu.matmul %18, %20, %cst_17 {dimension_numbers = #tpu.dot_dimension_numbers<[1], [0], [0], [1], [0, 0, 1, 1], [], []>} : vector<8x128xf32>, vector<128x128xf32>, vector<8x128xf32> -> vector<8x128xf32>
    %c2_18 = arith.constant 2 : index
    %c0_19 = arith.constant 0 : index
    %c0_20 = arith.constant 0 : index
    %22 = vector.load %arg4[%c2_18, %c0_19, %c0_20] : memref<7x1x128xf32, #tpu.memory_space<vmem>>, vector<1x1x128xf32>
    %23 = vector.shape_cast %22 : vector<1x1x128xf32> to vector<1x128xf32>
    %24 = vector.broadcast %23 : vector<1x128xf32> to vector<8x128xf32>
    %25 = arith.addf %21, %24 : vector<8x128xf32>
    %c3 = arith.constant 3 : index
    %c0_21 = arith.constant 0 : index
    %c0_22 = arith.constant 0 : index
    %26 = vector.load %arg3[%c3, %c0_21, %c0_22] : memref<7x128x128xf32, #tpu.memory_space<vmem>>, vector<1x128x128xf32>
    %27 = vector.shape_cast %26 : vector<1x128x128xf32> to vector<128x128xf32>
    %cst_23 = arith.constant dense<0.000000e+00> : vector<8x128xf32>
    %28 = tpu.matmul %18, %27, %cst_23 {dimension_numbers = #tpu.dot_dimension_numbers<[1], [0], [0], [1], [0, 0, 1, 1], [], []>} : vector<8x128xf32>, vector<128x128xf32>, vector<8x128xf32> -> vector<8x128xf32>
    %c3_24 = arith.constant 3 : index
    %c0_25 = arith.constant 0 : index
    %c0_26 = arith.constant 0 : index
    %29 = vector.load %arg4[%c3_24, %c0_25, %c0_26] : memref<7x1x128xf32, #tpu.memory_space<vmem>>, vector<1x1x128xf32>
    %30 = vector.shape_cast %29 : vector<1x1x128xf32> to vector<1x128xf32>
    %31 = vector.broadcast %30 : vector<1x128xf32> to vector<8x128xf32>
    %32 = arith.addf %28, %31 : vector<8x128xf32>
    %c0_27 = arith.constant 0 : index
    %c0_28 = arith.constant 0 : index
    %33 = vector.load %arg2[%c0_27, %c0_28] : memref<8x128xf32, #tpu.memory_space<vmem>>, vector<8x128xf32>
    %cst_29 = arith.constant 5.000000e-01 : f32
    %34 = vector.broadcast %cst_29 : f32 to vector<8x128xf32>
    %35 = arith.mulf %34, %32 : vector<8x128xf32>
    %36 = math.exp %35 : vector<8x128xf32>
    %37 = arith.mulf %33, %36 : vector<8x128xf32>
    %38 = arith.addf %25, %37 : vector<8x128xf32>
    %c4 = arith.constant 4 : index
    %c0_30 = arith.constant 0 : index
    %c0_31 = arith.constant 0 : index
    %39 = vector.load %arg3[%c4, %c0_30, %c0_31] : memref<7x128x128xf32, #tpu.memory_space<vmem>>, vector<1x128x128xf32>
    %40 = vector.shape_cast %39 : vector<1x128x128xf32> to vector<128x128xf32>
    %cst_32 = arith.constant dense<0.000000e+00> : vector<8x128xf32>
    %41 = tpu.matmul %38, %40, %cst_32 {dimension_numbers = #tpu.dot_dimension_numbers<[1], [0], [0], [1], [0, 0, 1, 1], [], []>} : vector<8x128xf32>, vector<128x128xf32>, vector<8x128xf32> -> vector<8x128xf32>
    %c4_33 = arith.constant 4 : index
    %c0_34 = arith.constant 0 : index
    %c0_35 = arith.constant 0 : index
    %42 = vector.load %arg4[%c4_33, %c0_34, %c0_35] : memref<7x1x128xf32, #tpu.memory_space<vmem>>, vector<1x1x128xf32>
    %43 = vector.shape_cast %42 : vector<1x1x128xf32> to vector<1x128xf32>
    %44 = vector.broadcast %43 : vector<1x128xf32> to vector<8x128xf32>
    %45 = arith.addf %41, %44 : vector<8x128xf32>
    %cst_36 = arith.constant 0.000000e+00 : f32
    %46 = vector.broadcast %cst_36 : f32 to vector<8x128xf32>
    %47 = arith.maximumf %45, %46 : vector<8x128xf32>
    %c5 = arith.constant 5 : index
    %c0_37 = arith.constant 0 : index
    %c0_38 = arith.constant 0 : index
    %48 = vector.load %arg3[%c5, %c0_37, %c0_38] : memref<7x128x128xf32, #tpu.memory_space<vmem>>, vector<1x128x128xf32>
    %49 = vector.shape_cast %48 : vector<1x128x128xf32> to vector<128x128xf32>
    %cst_39 = arith.constant dense<0.000000e+00> : vector<8x128xf32>
    %50 = tpu.matmul %47, %49, %cst_39 {dimension_numbers = #tpu.dot_dimension_numbers<[1], [0], [0], [1], [0, 0, 1, 1], [], []>} : vector<8x128xf32>, vector<128x128xf32>, vector<8x128xf32> -> vector<8x128xf32>
    %c5_40 = arith.constant 5 : index
    %c0_41 = arith.constant 0 : index
    %c0_42 = arith.constant 0 : index
    %51 = vector.load %arg4[%c5_40, %c0_41, %c0_42] : memref<7x1x128xf32, #tpu.memory_space<vmem>>, vector<1x1x128xf32>
    %52 = vector.shape_cast %51 : vector<1x1x128xf32> to vector<1x128xf32>
    %53 = vector.broadcast %52 : vector<1x128xf32> to vector<8x128xf32>
    %54 = arith.addf %50, %53 : vector<8x128xf32>
    %cst_43 = arith.constant 0.000000e+00 : f32
    %55 = vector.broadcast %cst_43 : f32 to vector<8x128xf32>
    %56 = arith.maximumf %54, %55 : vector<8x128xf32>
    %c6 = arith.constant 6 : index
    %c0_44 = arith.constant 0 : index
    %c0_45 = arith.constant 0 : index
    %57 = vector.load %arg3[%c6, %c0_44, %c0_45] : memref<7x128x128xf32, #tpu.memory_space<vmem>>, vector<1x128x128xf32>
    %58 = vector.shape_cast %57 : vector<1x128x128xf32> to vector<128x128xf32>
    %cst_46 = arith.constant dense<0.000000e+00> : vector<8x128xf32>
    %59 = tpu.matmul %56, %58, %cst_46 {dimension_numbers = #tpu.dot_dimension_numbers<[1], [0], [0], [1], [0, 0, 1, 1], [], []>} : vector<8x128xf32>, vector<128x128xf32>, vector<8x128xf32> -> vector<8x128xf32>
    %c6_47 = arith.constant 6 : index
    %c0_48 = arith.constant 0 : index
    %c0_49 = arith.constant 0 : index
    %60 = vector.load %arg4[%c6_47, %c0_48, %c0_49] : memref<7x1x128xf32, #tpu.memory_space<vmem>>, vector<1x1x128xf32>
    %61 = vector.shape_cast %60 : vector<1x1x128xf32> to vector<1x128xf32>
    %62 = vector.broadcast %61 : vector<1x128xf32> to vector<8x128xf32>
    %63 = arith.addf %59, %62 : vector<8x128xf32>
    %c0_50 = arith.constant 0 : index
    %c0_51 = arith.constant 0 : index
    %64 = vector.load %arg5[%c0_50, %c0_51] : memref<8x384xf32, #tpu.memory_space<vmem>>, vector<8x128xf32>
    tpu.vector_store %arg5[%c0_50, %c0_51], %63 {strides = array<i32>} : memref<8x384xf32, #tpu.memory_space<vmem>>, vector<8x128xf32>,
    %c0_52 = arith.constant 0 : index
    %c128 = arith.constant 128 : index
    %65 = vector.load %arg5[%c0_52, %c128] : memref<8x384xf32, #tpu.memory_space<vmem>>, vector<8x128xf32>
    tpu.vector_store %arg5[%c0_52, %c128], %25 {strides = array<i32>} : memref<8x384xf32, #tpu.memory_space<vmem>>, vector<8x128xf32>,
    %c0_53 = arith.constant 0 : index
    %c256 = arith.constant 256 : index
    %66 = vector.load %arg5[%c0_53, %c256] : memref<8x384xf32, #tpu.memory_space<vmem>>, vector<8x128xf32>
    tpu.vector_store %arg5[%c0_53, %c256], %32 {strides = array<i32>} : memref<8x384xf32, #tpu.memory_space<vmem>>, vector<8x128xf32>,
    return
  }
  func.func @transform_0(%arg0: i32) -> (i32, i32) {
    %c0_i32 = arith.constant 0 : i32
    %c0_i32_0 = arith.constant 0 : i32
    return %arg0, %c0_i32 : i32, i32
  }
  func.func @transform_1(%arg0: i32) -> (i32, i32) {
    %c0_i32 = arith.constant 0 : i32
    %c0_i32_0 = arith.constant 0 : i32
    return %arg0, %c0_i32 : i32, i32
  }
  func.func @transform_2(%arg0: i32) -> (i32, i32, i32) {
    %c0_i32 = arith.constant 0 : i32
    %c0_i32_0 = arith.constant 0 : i32
    %c0_i32_1 = arith.constant 0 : i32
    %c0_i32_2 = arith.constant 0 : i32
    return %c0_i32, %c0_i32_0, %c0_i32_1 : i32, i32, i32
  }
  func.func @transform_3(%arg0: i32) -> (i32, i32, i32) {
    %c0_i32 = arith.constant 0 : i32
    %c0_i32_0 = arith.constant 0 : i32
    %c0_i32_1 = arith.constant 0 : i32
    %c0_i32_2 = arith.constant 0 : i32
    return %c0_i32, %c0_i32_0, %c0_i32_1 : i32, i32, i32
  }
  func.func @transform_4(%arg0: i32) -> (i32, i32) {
    %c0_i32 = arith.constant 0 : i32
    %c0_i32_0 = arith.constant 0 : i32
    return %arg0, %c0_i32 : i32, i32
  }
}

</mosaic_0001>

<bundles_post_ra>
// kernel: tpu_custom_call.1
= control target key start
LH: loop header
LB: loop body
LE: loop exit
PB: predicated region body
PF: predicated region fallthrough
CT: control target
= control target key end

     0   :  { %9 = vsyncpa [#allocation3], 0  ;;  %s1571_s0 = inlined_call_operand.hbm [shape: f32[8,128], index: 0, kind: input, shape index: {}]   ;;  %s1572_s1 = inlined_call_operand.hbm [shape: f32[8,128], index: 1, kind: input, shape index: {}]   ;;  %s1573_s2 = inlined_call_operand.hbm [shape: f32[7,128,128], index: 2, kind: input, shape index: {}]   ;;  %s1574_s3 = inlined_call_operand.vmem [shape: f32[7,1,128], index: 3, kind: input, shape index: {}]   ;;  %s1575_s4 = inlined_call_operand.hbm [shape: f32[8,384], index: 4, kind: output, shape index: {}]  }
   0x1   :  { %10 = vsyncpa [#allocation6], 0 }
   0x2   :  { %11 = vsyncpa [#allocation4], 0  ;;  %s1398_s15 = smov [#allocation5]   ;;  %s1399_s17 = smov [#allocation2]  }
   0x3   :  { %s28_s16 = sshll.u32 %s1398_s15, 4  ;;  %s18_s18 = sshll.u32 %s1399_s17, 4  ;;  %s29_s16 = int_to_ptr.vmem [resolvable:$true] %s28_s16  ;;  %s19_s18 = int_to_ptr.vmem [resolvable:$true] %s18_s18 }
   0x4   :  { %s1304_s21 = scalar_lea.hbm %s1572_s1, 128 }
   0x5   :  { %p1305_p0 = scmp.ne.s32.totalorder %s1572_s1, %s1304_s21  ;;  %p1308_p1 = scmp.lt.u32.totalorder %s1304_s21, %s1572_s1 }
   0x7   :  { %p1310_p2 = pnand %p1308_p1, %p1305_p0 }
   0x9   :  { %1313 = shalt.err (!%p1310_p2)
}
   0xa   :  { %s1314_s26 = scalar_lea.vmem %s29_s16, 128  ;;  %p1319_p4 = scmp.lt.s32.totalorder %s29_s16, %s29_s16 }
   0xb   :  { %p1315_p3 = scmp.ne.s32.totalorder %s29_s16, %s1314_s26  ;;  %p1320_p5 = scmp.lt.s32.totalorder %s1314_s26, %s1314_s26 }
   0xd   :  { %p1321_p6 = por %p1320_p5, %p1319_p4 }
   0xf   :  { %p1322_p7 = pnand %p1321_p6, %p1315_p3 }
  0x11   :  { %1325 = shalt.err (!%p1322_p7)
}
  0x12   :  { %31 = dma.hbm_to_vmem [thread:$0]  %s1572_s1, 128, %s29_s16, [#allocation6]  }
  0x13   :  { %s1326_s5 = scalar_lea.hbm %s1571_s0, 128 }
  0x14   :  { %p1327_p8 = scmp.ne.s32.totalorder %s1571_s0, %s1326_s5  ;;  %p1330_p9 = scmp.lt.u32.totalorder %s1326_s5, %s1571_s0 }
  0x16   :  { %p1332_p10 = pnand %p1330_p9, %p1327_p8 }
  0x18   :  { %1335 = shalt.err (!%p1332_p10)
}
  0x19   :  { %s1336_s10 = scalar_lea.vmem %s19_s18, 128  ;;  %p1341_p12 = scmp.lt.s32.totalorder %s19_s18, %s19_s18 }
  0x1a   :  { %p1337_p11 = scmp.ne.s32.totalorder %s19_s18, %s1336_s10  ;;  %p1342_p13 = scmp.lt.s32.totalorder %s1336_s10, %s1336_s10 }
  0x1c   :  { %p1343_p0 = por %p1342_p13, %p1341_p12 }
  0x1e   :  { %p1344_p1 = pnand %p1343_p0, %p1337_p11 }
  0x20   :  { %1347 = shalt.err (!%p1344_p1)
}
  0x21   :  { %21 = dma.hbm_to_vmem [thread:$0]  %s1571_s0, 128, %s19_s18, [#allocation3]  }
  0x22   :  { %s1400_s12 = smov [#allocation7]   ;;  %s1348_s16 = scalar_lea.hbm %s1573_s2, 14336 }
  0x23   :  { %s37_s13 = sshll.u32 %s1400_s12, 4  ;;  %p1349_p2 = scmp.ne.s32.totalorder %s1573_s2, %s1348_s16  ;;  %s38_s13 = int_to_ptr.vmem [resolvable:$true] %s37_s13 }
  0x24   :  { %p1352_p3 = scmp.lt.u32.totalorder %s1348_s16, %s1573_s2 }
  0x26   :  { %p1354_p4 = pnand %p1352_p3, %p1349_p2 }
  0x28   :  { %1357 = shalt.err (!%p1354_p4)
}
  0x29   :  { %s1358_s22 = scalar_lea.vmem %s38_s13, 14336  ;;  %p1363_p6 = scmp.lt.s32.totalorder %s38_s13, %s38_s13 }
  0x2a   :  { %p1359_p5 = scmp.ne.s32.totalorder %s38_s13, %s1358_s22  ;;  %p1364_p7 = scmp.lt.s32.totalorder %s1358_s22, %s1358_s22 }
  0x2c   :  { %p1365_p8 = por %p1364_p7, %p1363_p6 }
  0x2e   :  { %p1366_p9 = pnand %p1365_p8, %p1359_p5 }
  0x30   :  { %1369 = shalt.err (!%p1366_p9)
}
  0x31   :  { %s1401_s0 = smov 128   ;;  %s1402_s18 = smov 8  }
  0x32   :  { %43 = dma.hbm_to_vmem [thread:$0]  %s1573_s2, 14336, %s38_s13, [#allocation6], %s1401_s0, %s1401_s0, %s1402_s18  }
  0x33   :  { %1392 = dma.done.wait [#allocation3], 128  }
  0x34   :  { %1393 = vsyncadd [#allocation3], 4294967168 }
  0x35   :  { %1394 = dma.done.wait [#allocation6], 14464  }
  0x36   :  { %1395 = vsyncadd [#allocation6], 4294952832  ;;  %v1403_v0 = vmov 0.0|0.0   ;;  %vm1404_vm0 = vmmov 0   ;;  %v1405_v1 = vmov 0.0   ;;  %v56_v2 = vld [vmem:[#allocation7] sm:$0xff] }
  0x37   :  { %1125 = vmatprep.subr.bf16.mxu0 %v1403_v0  ;;  %912 = vmatprep.mubr.msk.f32.mxu0 %vm1404_vm0, %v1405_v1  ;;  %v57_v3 = vld [vmem:[#allocation7 + $0x8] sm:$0xff]  ;;  %v58_v4 = vld [vmem:[#allocation7 + $0x10] sm:$0xff]  ;;  %v59_v6 = vld [vmem:[#allocation7 + $0x18] sm:$0xff]  ;;  %s1406_s11 = smov [#allocation8]  }
  0x38   :  { %1149 = vmatprep.subr.bf16.mxu1 %v1403_v0  ;;  %947 = vmatprep.mubr.msk.f32.mxu1 %vm1404_vm0, %v1405_v1  ;;  %v1126_v5 = vpack.c.bf16 %v57_v3, %v56_v2  ;;  %v1129_v7 = vpack.c.bf16 %v59_v6, %v58_v4  ;;  %v60_v8 = vld [vmem:[#allocation7 + $0x20] sm:$0xff]  ;;  %v61_v9 = vld [vmem:[#allocation7 + $0x28] sm:$0xff]  ;;  %v153_v12 = vld [vmem:[#allocation7 + $0x90] sm:$0xff]  ;;  %s738_s12 = sshll.u32 %s1406_s11, 4  ;;  %s739_s12 = int_to_ptr.vmem [resolvable:$true] %s738_s12 }
  0x39   :  { %v151_v10 = vld [vmem:[#allocation7 + $0x80] sm:$0xff]  ;;  %v152_v11 = vld [vmem:[#allocation7 + $0x88] sm:$0xff]  ;;  %v154_v13 = vld [vmem:[#allocation7 + $0x98] sm:$0xff]  ;;  %v1132_v14 = vpack.c.bf16 %v61_v9, %v60_v8  ;;  %s1370_s13 = scalar_lea.vmem %s739_s12, 384  ;;  %p1375_p11 = scmp.lt.s32.totalorder %s739_s12, %s739_s12 }
  0x3a   :  { %1127 = vmatpush3.bf16.msra.mxu0 %v1126_v5  ;;  %v1150_v15 = vpack.c.bf16 %v152_v11, %v151_v10  ;;  %v62_v16 = vld [vmem:[#allocation7 + $0x30] sm:$0xff]  ;;  %v63_v17 = vld [vmem:[#allocation7 + $0x38] sm:$0xff]  ;;  %v1153_v18 = vpack.c.bf16 %v154_v13, %v153_v12  ;;  %v155_v19 = vld [vmem:[#allocation7 + $0xa0] sm:$0xff]  ;;  %p1371_p10 = scmp.ne.s32.totalorder %s739_s12, %s1370_s13  ;;  %p1376_p12 = scmp.lt.s32.totalorder %s1370_s13, %s1370_s13 }
  0x3b   :  { %1128 = vmatprep.subr.bf16.mxu0 %v1403_v0  ;;  %v156_v20 = vld [vmem:[#allocation7 + $0xa8] sm:$0xff]  ;;  %v1135_v21 = vpack.c.bf16 %v63_v17, %v62_v16  ;;  %v64_v22 = vld [vmem:[#allocation7 + $0x40] sm:$0xff]  ;;  %v157_v25 = vld [vmem:[#allocation7 + $0xb0] sm:$0xff] }
  0x3c   :  { %1151 = vmatpush3.bf16.msra.mxu1 %v1150_v15  ;;  %v65_v23 = vld [vmem:[#allocation7 + $0x48] sm:$0xff]  ;;  %v1156_v24 = vpack.c.bf16 %v156_v20, %v155_v19  ;;  %v158_v26 = vld [vmem:[#allocation7 + $0xb8] sm:$0xff]  ;;  %v66_v28 = vld [vmem:[#allocation7 + $0x50] sm:$0xff]  ;;  %p1377_p13 = por %p1376_p12, %p1375_p11 }
  0x3d   :  { %1152 = vmatprep.subr.bf16.mxu1 %v1403_v0  ;;  %v1138_v27 = vpack.c.bf16 %v65_v23, %v64_v22  ;;  %v67_v29 = vld [vmem:[#allocation7 + $0x58] sm:$0xff]  ;;  %v1159_v30 = vpack.c.bf16 %v158_v26, %v157_v25  ;;  %v159_v31 = vld [vmem:[#allocation7 + $0xc0] sm:$0xff]  ;;  %v160_v32 = vld [vmem:[#allocation7 + $0xc8] sm:$0xff] }
  0x3e   :  { %1130 = vmatpush3.bf16.msra.mxu0 %v1129_v7  ;;  %v1141_v33 = vpack.c.bf16 %v67_v29, %v66_v28  ;;  %v68_v34 = vld [vmem:[#allocation7 + $0x60] sm:$0xff]  ;;  %v69_v35 = vld [vmem:[#allocation7 + $0x68] sm:$0xff]  ;;  %v1162_v36 = vpack.c.bf16 %v160_v32, %v159_v31  ;;  %v161_v37 = vld [vmem:[#allocation7 + $0xd0] sm:$0xff]  ;;  %p1378_p0 = pnand %p1377_p13, %p1371_p10 }
  0x3f   :  { %1131 = vmatprep.subr.bf16.mxu0 %v1403_v0  ;;  %v162_v38 = vld [vmem:[#allocation7 + $0xd8] sm:$0xff]  ;;  %v1144_v39 = vpack.c.bf16 %v69_v35, %v68_v34  ;;  %v70_v40 = vld [vmem:[#allocation7 + $0x70] sm:$0xff]  ;;  %v163_v43 = vld [vmem:[#allocation7 + $0xe0] sm:$0xff] }
  0x40   :  { %1154 = vmatpush3.bf16.msra.mxu1 %v1153_v18  ;;  %v71_v41 = vld [vmem:[#allocation7 + $0x78] sm:$0xff]  ;;  %v1165_v42 = vpack.c.bf16 %v162_v38, %v161_v37  ;;  %v164_v44 = vld [vmem:[#allocation7 + $0xe8] sm:$0xff]  ;;  %v55_v47 = vld [vmem:[#allocation2] sm:$0xff] }
  0x41   :  { %1155 = vmatprep.subr.bf16.mxu1 %v1403_v0  ;;  %v1147_v45 = vpack.c.bf16 %v71_v41, %v70_v40  ;;  %v1168_v46 = vpack.c.bf16 %v164_v44, %v163_v43  ;;  %v165_v48 = vld [vmem:[#allocation7 + $0xf0] sm:$0xff]  ;;  %v166_v49 = vld [vmem:[#allocation7 + $0xf8] sm:$0xff]  ;;  %v247_v51 = vld [vmem:[#allocation7 + $0x100] sm:$0xff] }
  0x42   :  { %1133 = vmatpush3.bf16.msra.mxu0 %v1132_v14  ;;  %v1171_v50 = vpack.c.bf16 %v166_v49, %v165_v48  ;;  %v248_v52 = vld [vmem:[#allocation7 + $0x108] sm:$0xff]  ;;  %v249_v54 = vld [vmem:[#allocation7 + $0x110] sm:$0xff]  ;;  %v250_v55 = vld [vmem:[#allocation7 + $0x118] sm:$0xff] }
  0x43   :  { %1134 = vmatprep.subr.bf16.mxu0 %v1403_v0  ;;  %v1174_v53 = vpack.c.bf16 %v248_v52, %v247_v51  ;;  %v1177_v56 = vpack.c.bf16 %v250_v55, %v249_v54  ;;  %v251_v57 = vld [vmem:[#allocation7 + $0x120] sm:$0xff]  ;;  %v252_v58 = vld [vmem:[#allocation7 + $0x128] sm:$0xff]  ;;  %v253_v60 = vld [vmem:[#allocation7 + $0x130] sm:$0xff] }
  0x44   :  { %1157 = vmatpush3.bf16.msra.mxu1 %v1156_v24  ;;  %v1180_v59 = vpack.c.bf16 %v252_v58, %v251_v57  ;;  %v254_v61 = vld [vmem:[#allocation7 + $0x138] sm:$0xff]  ;;  %v255_v63 = vld [vmem:[#allocation7 + $0x140] sm:$0xff]  ;;  %v256_v2 = vld [vmem:[#allocation7 + $0x148] sm:$0xff] }
  0x45   :  { %1158 = vmatprep.subr.bf16.mxu1 %v1403_v0  ;;  %v1183_v62 = vpack.c.bf16 %v254_v61, %v253_v60  ;;  %v1186_v3 = vpack.c.bf16 %v256_v2, %v255_v63  ;;  %v257_v4 = vld [vmem:[#allocation7 + $0x150] sm:$0xff]  ;;  %v258_v5 = vld [vmem:[#allocation7 + $0x158] sm:$0xff]  ;;  %v259_v7 = vld [vmem:[#allocation7 + $0x160] sm:$0xff] }
  0x46   :  { %1136 = vmatpush3.bf16.msra.mxu0 %v1135_v21  ;;  %v1189_v6 = vpack.c.bf16 %v258_v5, %v257_v4  ;;  %v260_v8 = vld [vmem:[#allocation7 + $0x168] sm:$0xff]  ;;  %v748_v10 = vld [vmem:[%s1574_s3] ss:$0 sm:$0xff]  ;;  %v342_v11 = vld [vmem:[#allocation7 + $0x180] sm:$0xff] }
  0x47   :  { %1137 = vmatprep.subr.bf16.mxu0 %v1403_v0  ;;  %v1192_v9 = vpack.c.bf16 %v260_v8, %v259_v7  ;;  %v343_v12 = vld [vmem:[#allocation7 + $0x188] sm:$0xff]  ;;  %v344_v18 = vld [vmem:[#allocation7 + $0x190] sm:$0xff]  ;;  %v345_v19 = vld [vmem:[#allocation7 + $0x198] sm:$0xff] }
  0x48   :  { %1160 = vmatpush3.bf16.msra.mxu1 %v1159_v30  ;;  %v1198_v16 = vpack.c.bf16 %v343_v12, %v342_v11  ;;  %v1201_v20 = vpack.c.bf16 %v345_v19, %v344_v18  ;;  %v346_v21 = vld [vmem:[#allocation7 + $0x1a0] sm:$0xff]  ;;  %v347_v22 = vld [vmem:[#allocation7 + $0x1a8] sm:$0xff]  ;;  %v348_v24 = vld [vmem:[#allocation7 + $0x1b0] sm:$0xff] }
  0x49   :  { %1161 = vmatprep.subr.bf16.mxu1 %v1403_v0  ;;  %v1204_v23 = vpack.c.bf16 %v347_v22, %v346_v21  ;;  %v349_v25 = vld [vmem:[#allocation7 + $0x1b8] sm:$0xff]  ;;  %v351_v28 = vld [vmem:[#allocation7 + $0x1c8] sm:$0xff]  ;;  %v352_v30 = vld [vmem:[#allocation7 + $0x1d0] sm:$0xff] }
  0x4a   :  { %1139 = vmatpush3.bf16.msra.mxu0 %v1138_v27  ;;  %v1207_v26 = vpack.c.bf16 %v349_v25, %v348_v24  ;;  %v350_v27 = vld [vmem:[#allocation7 + $0x1c0] sm:$0xff]  ;;  %v353_v31 = vld [vmem:[#allocation7 + $0x1d8] sm:$0xff]  ;;  %v355_v34 = vld [vmem:[#allocation7 + $0x1e8] sm:$0xff] }
  0x4b   :  { %1140 = vmatprep.subr.bf16.mxu0 %v1403_v0  ;;  %v1210_v29 = vpack.c.bf16 %v351_v28, %v350_v27  ;;  %v1213_v32 = vpack.c.bf16 %v353_v31, %v352_v30  ;;  %v262_v37 = vld [vmem:[#allocation7 + $0x178] sm:$0xff]  ;;  %v356_v38 = vld [vmem:[#allocation7 + $0x1f0] sm:$0xff]  ;;  %v443_v43 = vld [vmem:[#allocation7 + $0x200] sm:$0xff] }
  0x4c   :  { %1163 = vmatpush3.bf16.msra.mxu1 %v1162_v36  ;;  %v261_v36 = vld [vmem:[#allocation7 + $0x170] sm:$0xff]  ;;  %v357_v40 = vld [vmem:[#allocation7 + $0x1f8] sm:$0xff]  ;;  %v444_v44 = vld [vmem:[#allocation7 + $0x208] sm:$0xff] }
  0x4d   :  { %1164 = vmatprep.subr.bf16.mxu1 %v1403_v0  ;;  %v1219_v41 = vpack.c.bf16 %v357_v40, %v356_v38  ;;  %v1222_v48 = vpack.c.bf16 %v444_v44, %v443_v43  ;;  %v446_v51 = vld [vmem:[#allocation7 + $0x218] sm:$0xff]  ;;  %v448_v54 = vld [vmem:[#allocation7 + $0x228] sm:$0xff]  ;;  %v541_v11 = vld [vmem:[#allocation7 + $0x290] sm:$0xff] }
  0x4e   :  { %1142 = vmatpush3.bf16.msra.mxu0 %v1141_v33  ;;  %v354_v33 = vld [vmem:[#allocation7 + $0x1e0] sm:$0xff]  ;;  %v450_v57 = vld [vmem:[#allocation7 + $0x238] sm:$0xff]  ;;  %v452_v60 = vld [vmem:[#allocation7 + $0x248] sm:$0xff] }
  0x4f   :  { %1143 = vmatprep.subr.bf16.mxu0 %v1403_v0  ;;  %v1216_v35 = vpack.c.bf16 %v355_v34, %v354_v33  ;;  %v454_v63 = vld [vmem:[#allocation7 + $0x258] sm:$0xff]  ;;  %v456_v4 = vld [vmem:[#allocation7 + $0x268] sm:$0xff]  ;;  %v545_v18 = vld [vmem:[#allocation7 + $0x2b0] sm:$0xff] }
  0x50   :  { %1166 = vmatpush3.bf16.msra.mxu1 %v1165_v42  ;;  %v750_v42 = vld [vmem:[%s1574_s3 + $0x1] ss:$0 sm:$0xff]  ;;  %v458_v7 = vld [vmem:[#allocation7 + $0x278] sm:$0xff]  ;;  %v547_v21 = vld [vmem:[#allocation7 + $0x2c0] sm:$0xff] }
  0x51   :  { %1167 = vmatprep.subr.bf16.mxu1 %v1403_v0  ;;  %v546_v19 = vld [vmem:[#allocation7 + $0x2b8] sm:$0xff]  ;;  %v548_v22 = vld [vmem:[#allocation7 + $0x2c8] sm:$0xff]  ;;  %v549_v24 = vld [vmem:[#allocation7 + $0x2d0] sm:$0xff] }
  0x52   :  { %1145 = vmatpush3.bf16.msra.mxu0 %v1144_v39  ;;  %v1195_v39 = vpack.c.bf16 %v262_v37, %v261_v36  ;;  %v550_v25 = vld [vmem:[#allocation7 + $0x2d8] sm:$0xff]  ;;  %v551_v27 = vld [vmem:[#allocation7 + $0x2e0] sm:$0xff]  ;;  %v552_v28 = vld [vmem:[#allocation7 + $0x2e8] sm:$0xff] }
  0x53   :  { %1146 = vmatprep.subr.bf16.mxu0 %v1403_v0  ;;  %v752_v30 = vld [vmem:[%s1574_s3 + $0x2] ss:$0 sm:$0xff]  ;;  %v754_v31 = vld [vmem:[%s1574_s3 + $0x3] ss:$0 sm:$0xff]  ;;  %v436_v40 = vld [vmem:[#allocation5] sm:$0xff] }
  0x54   :  { %1169 = vmatpush3.bf16.msra.mxu1 %v1168_v46  ;;  %v553_v44 = vld [vmem:[#allocation7 + $0x2f0] sm:$0xff] }
  0x55   :  { %1170 = vmatprep.subr.bf16.mxu1 %v1403_v0 }
  0x56   :  { %1148 = vmatpush3.bf16.msra.mxu0 %v1147_v45 }
  0x57   :  { %1173 = vmatprep.subr.bf16.mxu0 %v1403_v0 }
  0x58   :  { %1172 = vmatpush3.bf16.msra.mxu1 %v1171_v50  ;;  %v445_v50 = vld [vmem:[#allocation7 + $0x210] sm:$0xff] }
  0x59   :  { %913 = vmatmul.mubr.f32.vlgmr.msra.gmra.mrb[0].mxu0 %v55_v47  ;;  %1197 = vmatprep.subr.bf16.mxu1 %v1403_v0  ;;  %v1225_v52 = vpack.c.bf16 %v446_v51, %v445_v50  ;;  %v638_v51 = vld [vmem:[#allocation7 + $0x318] sm:$0xff] }
  0x5a   :  { %982 = vmatprep.mubr.msk.f32.mxu0 %vm1404_vm0, %v1405_v1  ;;  %1175 = vmatpush3.bf16.msra.mxu0 %v1174_v53  ;;  %v447_v53 = vld [vmem:[#allocation7 + $0x220] sm:$0xff] }
  0x5b   :  { %1176 = vmatprep.subr.bf16.mxu0 %v1403_v0  ;;  %v1228_v55 = vpack.c.bf16 %v448_v54, %v447_v53  ;;  %v639_v53 = vld [vmem:[#allocation7 + $0x320] sm:$0xff]  ;;  %v640_v54 = vld [vmem:[#allocation7 + $0x328] sm:$0xff] }
  0x5e   :  { %1178 = vmatpush3.bf16.msra.mxu0 %v1177_v56  ;;  %v449_v56 = vld [vmem:[#allocation7 + $0x230] sm:$0xff] }
  0x5f   :  { %1179 = vmatprep.subr.bf16.mxu0 %v1403_v0  ;;  %v1231_v58 = vpack.c.bf16 %v450_v57, %v449_v56  ;;  %v642_v56 = vld [vmem:[#allocation7 + $0x338] sm:$0xff] }
  0x62   :  { %1181 = vmatpush3.bf16.msra.mxu0 %v1180_v59  ;;  %v451_v59 = vld [vmem:[#allocation7 + $0x240] sm:$0xff] }
  0x63   :  { %1182 = vmatprep.subr.bf16.mxu0 %v1403_v0  ;;  %v1234_v61 = vpack.c.bf16 %v452_v60, %v451_v59  ;;  %v644_v59 = vld [vmem:[#allocation7 + $0x348] sm:$0xff] }
  0x66   :  { %1184 = vmatpush3.bf16.msra.mxu0 %v1183_v62  ;;  %v453_v62 = vld [vmem:[#allocation7 + $0x250] sm:$0xff] }
  0x67   :  { %1185 = vmatprep.subr.bf16.mxu0 %v1403_v0  ;;  %v1237_v2 = vpack.c.bf16 %v454_v63, %v453_v62  ;;  %v646_v62 = vld [vmem:[#allocation7 + $0x358] sm:$0xff] }
  0x6a   :  { %1187 = vmatpush3.bf16.msra.mxu0 %v1186_v3  ;;  %v455_v3 = vld [vmem:[#allocation7 + $0x260] sm:$0xff] }
  0x6b   :  { %1188 = vmatprep.subr.bf16.mxu0 %v1403_v0  ;;  %v1240_v5 = vpack.c.bf16 %v456_v4, %v455_v3  ;;  %v648_v3 = vld [vmem:[#allocation7 + $0x368] sm:$0xff] }
  0x6e   :  { %1190 = vmatpush3.bf16.msra.mxu0 %v1189_v6  ;;  %v457_v6 = vld [vmem:[#allocation7 + $0x270] sm:$0xff] }
  0x6f   :  { %1191 = vmatprep.subr.bf16.mxu0 %v1403_v0  ;;  %v1243_v8 = vpack.c.bf16 %v458_v7, %v457_v6 }
  0x72   :  { %1193 = vmatpush3.bf16.msra.mxu0 %v1192_v9  ;;  %v539_v9 = vld [vmem:[#allocation7 + $0x280] sm:$0xff] }
  0x73   :  { %1194 = vmatprep.subr.bf16.mxu0 %v1403_v0 }
  0x76   :  { %1196 = vmatpush3.bf16.msra.mxu0 %v1195_v39 }
  0x77   :  { %1221 = vmatprep.subr.bf16.mxu0 %v1403_v0 }
 0x12c   :  { %v145_v13 = vpop.f32.mrb[0].mxu0 }
 0x12d   :  { %v146_v14 = vadd.f32 %v748_v10, %v145_v13  ;;  %v914_v15 = vpop.f32.mrb[1].mxu0  ;;  %v540_v10 = vld [vmem:[#allocation7 + $0x288] sm:$0xff]  ;;  %v542_v13 = vld [vmem:[#allocation7 + $0x298] sm:$0xff] }
 0x12e   :  { %v1246_v12 = vpack.c.bf16 %v540_v10, %v539_v9  ;;  %v543_v15 = vld [vmem:[#allocation7 + $0x2a0] sm:$0xff]  ;;  %v649_v10 = vld [vmem:[#allocation7 + $0x370] sm:$0xff] }
 0x12f   :  { %v149_v17 = vmax.f32 %v146_v14, 0.0  ;;  %v1249_v14 = vpack.c.bf16 %v542_v13, %v541_v11  ;;  %v650_v11 = vld [vmem:[#allocation7 + $0x378] sm:$0xff]  ;;  %v758_v13 = vld [vmem:[%s1574_s3 + $0x5] ss:$0 sm:$0xff] }
 0x131   :  { %948 = vmatmul.mubr.f32.vlgmr.msra.gmra.mrb[0].mxu1 %v149_v17 }
 0x132   :  { %1199 = vmatpush3.bf16.msra.mxu1 %v1198_v16  ;;  %1017 = vmatprep.mubr.msk.f32.mxu1 %vm1404_vm0, %v1405_v1  ;;  %v544_v16 = vld [vmem:[#allocation7 + $0x2a8] sm:$0xff] }
 0x133   :  { %1200 = vmatprep.subr.bf16.mxu1 %v1403_v0  ;;  %v1252_v17 = vpack.c.bf16 %v544_v16, %v543_v15 }
 0x136   :  { %1202 = vmatpush3.bf16.msra.mxu1 %v1201_v20  ;;  %v1255_v20 = vpack.c.bf16 %v546_v19, %v545_v18 }
 0x137   :  { %1203 = vmatprep.subr.bf16.mxu1 %v1403_v0 }
 0x13a   :  { %1205 = vmatpush3.bf16.msra.mxu1 %v1204_v23  ;;  %v1258_v23 = vpack.c.bf16 %v548_v22, %v547_v21 }
 0x13b   :  { %1206 = vmatprep.subr.bf16.mxu1 %v1403_v0 }
 0x13e   :  { %1208 = vmatpush3.bf16.msra.mxu1 %v1207_v26  ;;  %v1261_v26 = vpack.c.bf16 %v550_v25, %v549_v24 }
 0x13f   :  { %1209 = vmatprep.subr.bf16.mxu1 %v1403_v0 }
 0x142   :  { %1211 = vmatpush3.bf16.msra.mxu1 %v1210_v29  ;;  %v1264_v29 = vpack.c.bf16 %v552_v28, %v551_v27 }
 0x143   :  { %1212 = vmatprep.subr.bf16.mxu1 %v1403_v0 }
 0x146   :  { %1214 = vmatpush3.bf16.msra.mxu1 %v1213_v32 }
 0x147   :  { %1215 = vmatprep.subr.bf16.mxu1 %v1403_v0 }
 0x14a   :  { %1217 = vmatpush3.bf16.msra.mxu1 %v1216_v35 }
 0x14b   :  { %1218 = vmatprep.subr.bf16.mxu1 %v1403_v0 }
 0x14e   :  { %1220 = vmatpush3.bf16.msra.mxu1 %v1219_v41 }
 0x14f   :  { %1245 = vmatprep.subr.bf16.mxu1 %v1403_v0 }
 0x204   :  { %v241_v45 = vpop.f32.mrb[0].mxu1 }
 0x205   :  { %v242_v46 = vadd.f32 %v750_v42, %v241_v45  ;;  %v949_v47 = vpop.f32.mrb[1].mxu1  ;;  %v554_v45 = vld [vmem:[#allocation7 + $0x2f8] sm:$0xff] }
 0x206   :  { %v635_v47 = vld [vmem:[#allocation7 + $0x300] sm:$0xff] }
 0x207   :  { %v245_v49 = vmax.f32 %v242_v46, 0.0  ;;  %v1267_v46 = vpack.c.bf16 %v554_v45, %v553_v44 }
 0x209   :  { %983 = vmatmul.mubr.f32.vlgmr.msra.gmra.mrb[2].mxu0 %v245_v49  ;;  %1018 = vmatmul.mubr.f32.vlgmr.msra.gmra.mrb[2].mxu1 %v245_v49  ;;  %v637_v49 = vld [vmem:[#allocation7 + $0x310] sm:$0xff] }
 0x20a   :  { %1223 = vmatpush3.bf16.msra.mxu0 %v1222_v48  ;;  %1052 = vmatprep.mubr.msk.f32.mxu0 %vm1404_vm0, %v1405_v1  ;;  %v636_v48 = vld [vmem:[#allocation7 + $0x308] sm:$0xff] }
 0x20b   :  { %1224 = vmatprep.subr.bf16.mxu0 %v1403_v0  ;;  %1087 = vmatprep.mubr.msk.f32.mxu1 %vm1404_vm0, %v1405_v1  ;;  %v1270_v50 = vpack.c.bf16 %v636_v48, %v635_v47 }
 0x20c   :  { %1247 = vmatpush3.bf16.msra.mxu1 %v1246_v12  ;;  %v1291_v12 = vpack.c.bf16 %v650_v11, %v649_v10 }
 0x20d   :  { %1248 = vmatprep.subr.bf16.mxu1 %v1403_v0 }
 0x20e   :  { %1226 = vmatpush3.bf16.msra.mxu0 %v1225_v52  ;;  %v1273_v52 = vpack.c.bf16 %v638_v51, %v637_v49 }
 0x20f   :  { %1227 = vmatprep.subr.bf16.mxu0 %v1403_v0 }
 0x210   :  { %1250 = vmatpush3.bf16.msra.mxu1 %v1249_v14 }
 0x211   :  { %1251 = vmatprep.subr.bf16.mxu1 %v1403_v0 }
 0x212   :  { %1229 = vmatpush3.bf16.msra.mxu0 %v1228_v55  ;;  %v1276_v55 = vpack.c.bf16 %v640_v54, %v639_v53 }
 0x213   :  { %1230 = vmatprep.subr.bf16.mxu0 %v1403_v0 }
 0x214   :  { %1253 = vmatpush3.bf16.msra.mxu1 %v1252_v17  ;;  %v760_v17 = vld [vmem:[%s1574_s3 + $0x6] ss:$0 sm:$0xff] }
 0x215   :  { %1254 = vmatprep.subr.bf16.mxu1 %v1403_v0 }
 0x216   :  { %1232 = vmatpush3.bf16.msra.mxu0 %v1231_v58  ;;  %v643_v58 = vld [vmem:[#allocation7 + $0x340] sm:$0xff] }
 0x217   :  { %1233 = vmatprep.subr.bf16.mxu0 %v1403_v0  ;;  %v1282_v60 = vpack.c.bf16 %v644_v59, %v643_v58 }
 0x218   :  { %1256 = vmatpush3.bf16.msra.mxu1 %v1255_v20 }
 0x219   :  { %1257 = vmatprep.subr.bf16.mxu1 %v1403_v0 }
 0x21a   :  { %1235 = vmatpush3.bf16.msra.mxu0 %v1234_v61  ;;  %v645_v61 = vld [vmem:[#allocation7 + $0x350] sm:$0xff] }
 0x21b   :  { %1236 = vmatprep.subr.bf16.mxu0 %v1403_v0  ;;  %v1285_v63 = vpack.c.bf16 %v646_v62, %v645_v61 }
 0x21c   :  { %1259 = vmatpush3.bf16.msra.mxu1 %v1258_v23 }
 0x21d   :  { %1260 = vmatprep.subr.bf16.mxu1 %v1403_v0 }
 0x21e   :  { %1238 = vmatpush3.bf16.msra.mxu0 %v1237_v2  ;;  %v647_v2 = vld [vmem:[#allocation7 + $0x360] sm:$0xff] }
 0x21f   :  { %1239 = vmatprep.subr.bf16.mxu0 %v1403_v0  ;;  %v1288_v4 = vpack.c.bf16 %v648_v3, %v647_v2 }
 0x220   :  { %1262 = vmatpush3.bf16.msra.mxu1 %v1261_v26 }
 0x221   :  { %1263 = vmatprep.subr.bf16.mxu1 %v1403_v0 }
 0x222   :  { %1241 = vmatpush3.bf16.msra.mxu0 %v1240_v5  ;;  %v756_v5 = vld [vmem:[%s1574_s3 + $0x4] ss:$0 sm:$0xff] }
 0x223   :  { %1242 = vmatprep.subr.bf16.mxu0 %v1403_v0 }
 0x224   :  { %1265 = vmatpush3.bf16.msra.mxu1 %v1264_v29 }
 0x225   :  { %1266 = vmatprep.subr.bf16.mxu1 %v1403_v0 }
 0x226   :  { %1244 = vmatpush3.bf16.msra.mxu0 %v1243_v8 }
 0x227   :  { %1269 = vmatprep.subr.bf16.mxu0 %v1403_v0 }
 0x228   :  { %1268 = vmatpush3.bf16.msra.mxu1 %v1267_v46 }
 0x2dc   :  { %v337_v32 = vpop.f32.mrb[2].mxu0  ;;  %v432_v33 = vpop.f32.mrb[2].mxu1 }
 0x2dd   :  { %v338_v34 = vadd.f32 %v752_v30, %v337_v32  ;;  %v433_v35 = vadd.f32 %v754_v31, %v432_v33  ;;  %v984_v36 = vpop.f32.mrb[3].mxu0  ;;  %v1019_v37 = vpop.f32.mrb[3].mxu1 }
 0x2df   :  { %730 = vst [vmem:[#allocation8 + $0x8] sm:$0xff] %v338_v34  ;;  %v437_v38 = vmul.f32 0.5, %v433_v35  ;;  %731 = vst [vmem:[#allocation8 + $0x10] sm:$0xff] %v433_v35 }
 0x2e1   :  { %v438_v39 = vmul.f32 1.442695, %v437_v38 }
 0x2e3   :  { %1302 = vpow2.f32 %v438_v39 }
 0x2ed   :  { %v1303_v41 = vpop.eup %1302 }
 0x2ee   :  { %v440_v42 = vmul.f32 %v1303_v41, %v436_v40 }
 0x2f0   :  { %v441_v43 = vadd.f32 %v440_v42, %v338_v34 }
 0x2f2   :  { %1053 = vmatmul.mubr.f32.vlgmr.msra.gmra.mrb[4].mxu0 %v441_v43 }
 0x2f3   :  { %1122 = vmatprep.mubr.msk.f32.mxu0 %vm1404_vm0, %v1405_v1  ;;  %1271 = vmatpush3.bf16.msra.mxu0 %v1270_v50  ;;  %v641_v1 = vld [vmem:[#allocation7 + $0x330] sm:$0xff] }
 0x2f4   :  { %1272 = vmatprep.subr.bf16.mxu0 %v1403_v0  ;;  %v1279_v57 = vpack.c.bf16 %v642_v56, %v641_v1 }
 0x2f7   :  { %1274 = vmatpush3.bf16.msra.mxu0 %v1273_v52 }
 0x2f8   :  { %1275 = vmatprep.subr.bf16.mxu0 %v1403_v0 }
 0x2fb   :  { %1277 = vmatpush3.bf16.msra.mxu0 %v1276_v55 }
 0x2fc   :  { %1278 = vmatprep.subr.bf16.mxu0 %v1403_v0 }
 0x2ff   :  { %1280 = vmatpush3.bf16.msra.mxu0 %v1279_v57 }
 0x300   :  { %1281 = vmatprep.subr.bf16.mxu0 %v1403_v0 }
 0x303   :  { %1283 = vmatpush3.bf16.msra.mxu0 %v1282_v60 }
 0x304   :  { %1284 = vmatprep.subr.bf16.mxu0 %v1403_v0 }
 0x307   :  { %1286 = vmatpush3.bf16.msra.mxu0 %v1285_v63 }
 0x308   :  { %1287 = vmatprep.subr.bf16.mxu0 %v1403_v0 }
 0x30b   :  { %1289 = vmatpush3.bf16.msra.mxu0 %v1288_v4 }
 0x30c   :  { %1290 = vmatprep.subr.bf16.mxu0 %v1403_v0 }
 0x30f   :  { %1292 = vmatpush3.bf16.msra.mxu0 %v1291_v12 }
 0x3c5   :  { %v533_v6 = vpop.f32.mrb[4].mxu0 }
 0x3c6   :  { %v534_v7 = vadd.f32 %v756_v5, %v533_v6  ;;  %v1054_v8 = vpop.f32.mrb[5].mxu0 }
 0x3c8   :  { %v537_v9 = vmax.f32 %v534_v7, 0.0 }
 0x3ca   :  { %1088 = vmatmul.mubr.f32.vlgmr.msra.gmra.mrb[4].mxu1 %v537_v9 }
 0x49d   :  { %v629_v14 = vpop.f32.mrb[4].mxu1 }
 0x49e   :  { %v630_v15 = vadd.f32 %v758_v13, %v629_v14  ;;  %v1089_v0 = vpop.f32.mrb[5].mxu1 }
 0x4a0   :  { %v633_v16 = vmax.f32 %v630_v15, 0.0 }
 0x4a2   :  { %1123 = vmatmul.mubr.f32.vlgmr.msra.gmra.mrb[6].mxu0 %v633_v16 }
 0x575   :  { %v725_v18 = vpop.f32.mrb[6].mxu0 }
 0x576   :  { %v726_v19 = vadd.f32 %v760_v17, %v725_v18  ;;  %v1124_v20 = vpop.f32.mrb[7].mxu0 }
 0x578   :  { %729 = vst [vmem:[#allocation8] sm:$0xff] %v726_v19 }
 0x579   :  { %1381 = shalt.err (!%p1378_p0)
}
 0x57a   :  { %s1382_s16 = scalar_lea.hbm %s1575_s4, 384 }
 0x57b   :  { %p1383_p1 = scmp.ne.s32.totalorder %s1575_s4, %s1382_s16  ;;  %p1386_p2 = scmp.lt.u32.totalorder %s1382_s16, %s1575_s4 }
 0x57d   :  { %p1388_p3 = pnand %p1386_p2, %p1383_p1 }
 0x57f   :  { %1391 = shalt.err (!%p1388_p3)
}
 0x580   :  { %741 = dma.vmem_to_hbm [thread:$0]  %s739_s12, 384, %s1575_s4, [#allocation4]  }
 0x581   :  { %1396 = dma.done.wait [#allocation4], 384  }
 0x582   :  { %1397 = vsyncadd [#allocation4], 4294966912 }
 0x583   :  { %745 = vsyncpa [#allocation3], 1 }
 0x584   :  { %746 = vsyncpa [#allocation6], 1 }
 0x585   :  { %747 = vsyncpa [#allocation4], 1 }

</bundles_post_ra>
